<compile_context>
chip_gen: v7x
topology: tpu7x:2x2x1
jax: 0.10.0
libtpu: 0.0.40
codegen_flags: <defaults>
</compile_context>

<pallas_src>
import functools

import jax
import jax.numpy as jnp
from jax.experimental import pallas as pl
from jax.experimental.pallas import tpu as pltpu


def _round_up(x, m):
    return ((x + m - 1) // m) * m


def attention_pool_kernel(hidden_ref, mask_ref, v_ref, bq_ref,
                          pooled_ref, attn_ref, attn_sum_ref):
    f32 = jnp.float32
    h = hidden_ref[...].astype(f32)                    # (BB, S, H)
    keep = mask_ref[...] > 0                           # (BB, S) bool
    v = v_ref[...].astype(f32).reshape(1, 1, -1)       # (1, 1, H) == W @ q
    bq = bq_ref[0]                                     # scalar (SMEM), == b . q

    # scores[b, s] = <h[b, s, :], W @ q> + b . q  (== ((h @ W + b) @ q)[b, s])
    # VPU multiply + lane reduce: no MXU M=1 fill, no per-batch XLU transpose.
    scores = jnp.sum(h * v, axis=-1) + bq              # (BB, S)

    # Masked softmax over the sequence (lane) axis.
    masked_scores = jnp.where(keep, scores, jnp.float32(-1e32))
    m = jnp.max(masked_scores, axis=-1, keepdims=True)     # (BB, 1)
    e = jnp.exp(masked_scores - m)                         # (BB, S)
    denom = jnp.sum(e, axis=-1, keepdims=True)             # (BB, 1)
    inv = 1.0 / denom                                      # one divide per row
    attn = e * inv                                         # (BB, S)
    attn_ref[...] = attn

    # Second masking, then attention-weighted pooling over the sequence.
    masked_attn = jnp.where(keep, attn, 0.0)               # (BB, S)
    attn_sum_ref[...] = jnp.sum(masked_attn, axis=-1, keepdims=True)   # (BB, 1)
    pooled_ref[...] = jnp.sum(masked_attn[:, :, None] * h, axis=1)     # (BB, H)


def _pick_block_b(B, S, H, h_itemsize):
    """Batch block: big enough that the double-buffered h tile is multi-MiB,
    a multiple of 8 (sublane rule for the 2-D blocks), and keeps >= 2 grid
    steps when the batch is tiled."""
    row_bytes = _round_up(S, 8) * _round_up(H, 128) * h_itemsize
    target_per_buffer = 4 * 1024 * 1024          # ~4 MiB/buf -> ~8 MiB dbl-buffered
    bb = max(8, (target_per_buffer // max(row_bytes, 1)) // 8 * 8)
    if bb >= B:
        return B                                  # single block (full-dim block)
    return int(bb)


def _vmem_limit_bytes(BB, S, H, h_itemsize, mask_itemsize):
    lane_h = _round_up(H, 128)
    lane_s = _round_up(S, 128)
    sub_s = _round_up(S, 8)
    sub_bb = _round_up(BB, 8)
    h_block = BB * sub_s * lane_h
    est = (2 * h_block * h_itemsize             # double-buffered h input
           + 2 * sub_bb * lane_s * mask_itemsize
           + 2 * 8 * lane_h * 4                 # v (1, H)
           + 2 * sub_bb * lane_h * 4            # pooled output
           + 2 * sub_bb * lane_s * 4            # attn output
           + 2 * sub_bb * 128 * 4               # attn_sum output
           + 3 * h_block * 4)                   # headroom for f32 intermediates
    # >= 32 MiB (v5e scoped default is only 16 MiB), <= 48 MiB (fits v7x 64 MiB/TC).
    return int(min(max(est * 5 // 4, 32 * 1024 * 1024), 48 * 1024 * 1024))


@functools.partial(jax.jit, static_argnames=("block_b",))
def attention_forward(batch_hidden, batch_masks, weight, bias, query,
                      *, block_b=None):
    B, S, H = batch_hidden.shape
    f32 = jnp.float32
    hp = jax.lax.Precision.HIGHEST

    w32 = weight.astype(f32)
    b32 = bias.astype(f32)
    q32 = query.astype(f32)

    # Project the query through W once; `key` is never built.
    v = jnp.dot(w32, q32, precision=hp)          # (H,)
    bq = jnp.dot(b32, q32, precision=hp)         # scalar

    h_itemsize = jnp.dtype(batch_hidden.dtype).itemsize
    m_itemsize = jnp.dtype(batch_masks.dtype).itemsize
    if block_b is None:
        BB = _pick_block_b(B, S, H, h_itemsize)
    else:
        BB = min(int(block_b), B)
    grid = (pl.cdiv(B, BB),)                     # no padding copy of h

    pooled, attn, attn_sum = pl.pallas_call(
        attention_pool_kernel,
        out_shape=(
            jax.ShapeDtypeStruct((B, H), f32),   # masked_attn @ h
            jax.ShapeDtypeStruct((B, S), f32),   # attention weights
            jax.ShapeDtypeStruct((B, 1), f32),   # sum(masked_attn)
        ),
        grid_spec=pltpu.PrefetchScalarGridSpec(
            num_scalar_prefetch=0,
            grid=grid,
            in_specs=[
                pl.BlockSpec((BB, S, H), lambda b: (b, 0, 0)),   # hidden (native dtype)
                pl.BlockSpec((BB, S), lambda b: (b, 0)),         # mask
                pl.BlockSpec((1, H), lambda b: (0, 0)),          # W @ query
                pl.BlockSpec(memory_space=pltpu.MemorySpace.SMEM),  # bias . query
            ],
            out_specs=[
                pl.BlockSpec((BB, H), lambda b: (b, 0)),
                pl.BlockSpec((BB, S), lambda b: (b, 0)),
                pl.BlockSpec((BB, 1), lambda b: (b, 0)),
            ],
        ),
        compiler_params=pltpu.CompilerParams(
            dimension_semantics=("parallel",),
            vmem_limit_bytes=_vmem_limit_bytes(BB, S, H, h_itemsize, m_itemsize),
        ),
    )(batch_hidden, batch_masks, v.reshape(1, H), bq.reshape(1))

    # Epilogue (full-batch rank-H GEMM in XLA, better MXU fill than per-block):
    #   out = (masked_attn @ h) @ W + sum(masked_attn) * bias
    batch_outputs = jnp.dot(pooled, w32, precision=hp) + attn_sum * b32[None, :]
    return batch_outputs, attn


def reference_forward(batch_hidden, batch_masks, weight, bias, query):
    hp = jax.lax.Precision.HIGHEST
    key = jnp.einsum("bsh,hk->bsk", batch_hidden, weight, precision=hp) + bias
    outputs = jnp.einsum("bsk,k->bs", key, query, precision=hp)
    keep = batch_masks > 0
    masked_outputs = jnp.where(keep, outputs, jnp.full_like(outputs, -1e32))
    attn = jax.nn.softmax(masked_outputs, axis=1)
    masked_attn = jnp.where(keep, attn, 0.0)
    batch_outputs = jnp.einsum("bs,bsh->bh", masked_attn, key, precision=hp)
    return batch_outputs, attn


if __name__ == "__main__":
    B, S, H = 2, 8, 32
    key0 = jax.random.PRNGKey(0)
    k1, k2, k3, k4 = jax.random.split(key0, 4)

    # Parameters (deterministic, matching the module's shapes; non-zero bias
    # exercises the bias.query path even though the module inits bias to 0).
    weight = 0.05 * jax.random.normal(k1, (H, H), dtype=jnp.float32)
    bias = 0.05 * jax.random.normal(k4, (H,), dtype=jnp.float32)
    query = 0.05 * jax.random.normal(k2, (H,), dtype=jnp.float32)

    # Inputs: second sequence has trailing padding positions.
    batch_hidden = jax.random.normal(k3, (B, S, H), dtype=jnp.float32)
    batch_masks = jnp.array(
        [[1.0] * S,
         [1.0] * (S - 3) + [0.0] * 3], dtype=jnp.float32)

    out, attn = attention_forward(batch_hidden, batch_masks, weight, bias, query)
    out = jax.block_until_ready(out)
    attn = jax.block_until_ready(attn)

    ref_out, ref_attn = reference_forward(batch_hidden, batch_masks,
                                          weight, bias, query)
    assert jnp.allclose(out, ref_out, atol=1e-5, rtol=1e-5), (
        float(jnp.max(jnp.abs(out - ref_out))))
    assert jnp.allclose(attn, ref_attn, atol=1e-5, rtol=1e-5), (
        float(jnp.max(jnp.abs(attn - ref_attn))))

    print("KERNEL_OK")
</pallas_src>

<mosaic_0001>
module attributes {stable_mosaic.version = 11 : i64} {
  func.func @attention_pool_kernel(%arg0: i32, %arg1: memref<2x8x32xf32, #tpu.memory_space<vmem>>, %arg2: memref<2x8xf32, #tpu.memory_space<vmem>>, %arg3: memref<1x32xf32, #tpu.memory_space<vmem>>, %arg4: memref<1xf32, #tpu.memory_space<smem>>, %arg5: memref<2x32xf32, #tpu.memory_space<vmem>>, %arg6: memref<2x8xf32, #tpu.memory_space<vmem>>, %arg7: memref<2x1xf32, #tpu.memory_space<vmem>>) attributes {dimension_semantics = [#tpu.dimension_semantics<parallel>], iteration_bounds = array<i64: 1>, scalar_prefetch = 0 : i64, scratch_operands = 0 : i64, tpu.core_type = #tpu.core_type<tc>, window_params = [{transform_indices = @transform_0, window_bounds = array<i64: 2, 8, 32>}, {transform_indices = @transform_1, window_bounds = array<i64: 2, 8>}, {pipeline_mode = #tpu.pipeline_mode<synchronous>, transform_indices = @transform_2, window_bounds = array<i64: 1, 32>}, {transform_indices = @transform_3, window_bounds = array<i64: 1>}, {transform_indices = @transform_4, window_bounds = array<i64: 2, 32>}, {transform_indices = @transform_5, window_bounds = array<i64: 2, 8>}, {transform_indices = @transform_6, window_bounds = array<i64: 2, 1>}]} {
    %c0 = arith.constant 0 : index
    %c0_0 = arith.constant 0 : index
    %c0_1 = arith.constant 0 : index
    %0 = vector.load %arg1[%c0, %c0_0, %c0_1] : memref<2x8x32xf32, #tpu.memory_space<vmem>>, vector<2x8x32xf32>
    %c0_2 = arith.constant 0 : index
    %c0_3 = arith.constant 0 : index
    %1 = vector.load %arg2[%c0_2, %c0_3] : memref<2x8xf32, #tpu.memory_space<vmem>>, vector<2x8xf32>
    %cst = arith.constant 0.000000e+00 : f32
    %2 = vector.broadcast %cst : f32 to vector<2x8xf32>
    %3 = arith.cmpf ogt, %1, %2 : vector<2x8xf32>
    %c0_4 = arith.constant 0 : index
    %c0_5 = arith.constant 0 : index
    %4 = vector.load %arg3[%c0_4, %c0_5] : memref<1x32xf32, #tpu.memory_space<vmem>>, vector<1x32xf32>
    %5 = vector.shape_cast %4 : vector<1x32xf32> to vector<1x1x32xf32>
    %c0_6 = arith.constant 0 : index
    %6 = memref.load %arg4[%c0_6] : memref<1xf32, #tpu.memory_space<smem>>
    %7 = vector.broadcast %5 : vector<1x1x32xf32> to vector<2x8x32xf32>
    %8 = arith.mulf %0, %7 : vector<2x8x32xf32>
    %cst_7 = arith.constant dense<0.000000e+00> : vector<2x8xf32>
    %9 = vector.multi_reduction <add>, %8, %cst_7 [2] : vector<2x8x32xf32> to vector<2x8xf32>
    %10 = vector.broadcast %6 : f32 to vector<2x8xf32>
    %11 = arith.addf %9, %10 : vector<2x8xf32>
    %cst_8 = arith.constant -1.000000e+32 : f32
    %12 = vector.broadcast %cst_8 : f32 to vector<2x8xf32>
    %13 = arith.select %3, %11, %12 : vector<2x8xi1>, vector<2x8xf32>
    %cst_9 = arith.constant dense<0xFF800000> : vector<2xf32>
    %14 = vector.multi_reduction <maximumf>, %13, %cst_9 [1] : vector<2x8xf32> to vector<2xf32>
    %15 = vector.shape_cast %14 : vector<2xf32> to vector<2x1xf32>
    %16 = vector.broadcast %15 : vector<2x1xf32> to vector<2x8xf32>
    %17 = arith.subf %13, %16 : vector<2x8xf32>
    %18 = math.exp %17 : vector<2x8xf32>
    %cst_10 = arith.constant dense<0.000000e+00> : vector<2xf32>
    %19 = vector.multi_reduction <add>, %18, %cst_10 [1] : vector<2x8xf32> to vector<2xf32>
    %20 = vector.shape_cast %19 : vector<2xf32> to vector<2x1xf32>
    %cst_11 = arith.constant 1.000000e+00 : f32
    %21 = vector.broadcast %cst_11 : f32 to vector<2x1xf32>
    %22 = arith.divf %21, %20 : vector<2x1xf32>
    %23 = vector.broadcast %22 : vector<2x1xf32> to vector<2x8xf32>
    %24 = arith.mulf %18, %23 : vector<2x8xf32>
    %c0_12 = arith.constant 0 : index
    %c0_13 = arith.constant 0 : index
    %25 = vector.load %arg6[%c0_12, %c0_13] : memref<2x8xf32, #tpu.memory_space<vmem>>, vector<2x8xf32>
    tpu.vector_store %arg6[%c0_12, %c0_13], %24 {strides = array<i32>} : memref<2x8xf32, #tpu.memory_space<vmem>>, vector<2x8xf32>,
    %cst_14 = arith.constant 0.000000e+00 : f32
    %26 = vector.broadcast %cst_14 : f32 to vector<2x8xf32>
    %27 = arith.select %3, %24, %26 : vector<2x8xi1>, vector<2x8xf32>
    %cst_15 = arith.constant dense<0.000000e+00> : vector<2xf32>
    %28 = vector.multi_reduction <add>, %27, %cst_15 [1] : vector<2x8xf32> to vector<2xf32>
    %29 = vector.shape_cast %28 : vector<2xf32> to vector<2x1xf32>
    %c0_16 = arith.constant 0 : index
    %c0_17 = arith.constant 0 : index
    %30 = vector.load %arg7[%c0_16, %c0_17] : memref<2x1xf32, #tpu.memory_space<vmem>>, vector<2x1xf32>
    tpu.vector_store %arg7[%c0_16, %c0_17], %29 {strides = array<i32>} : memref<2x1xf32, #tpu.memory_space<vmem>>, vector<2x1xf32>,
    %31 = vector.shape_cast %27 : vector<2x8xf32> to vector<2x8x1xf32>
    %32 = vector.broadcast %31 : vector<2x8x1xf32> to vector<2x8x32xf32>
    %33 = arith.mulf %32, %0 : vector<2x8x32xf32>
    %cst_18 = arith.constant dense<0.000000e+00> : vector<2x32xf32>
    %34 = vector.multi_reduction <add>, %33, %cst_18 [1] : vector<2x8x32xf32> to vector<2x32xf32>
    %c0_19 = arith.constant 0 : index
    %c0_20 = arith.constant 0 : index
    %35 = vector.load %arg5[%c0_19, %c0_20] : memref<2x32xf32, #tpu.memory_space<vmem>>, vector<2x32xf32>
    tpu.vector_store %arg5[%c0_19, %c0_20], %34 {strides = array<i32>} : memref<2x32xf32, #tpu.memory_space<vmem>>, vector<2x32xf32>,
    return
  }
  func.func @transform_0(%arg0: i32) -> (i32, i32, i32) {
    %c0_i32 = arith.constant 0 : i32
    %c0_i32_0 = arith.constant 0 : i32
    %c0_i32_1 = arith.constant 0 : i32
    return %arg0, %c0_i32, %c0_i32_0 : i32, i32, i32
  }
  func.func @transform_1(%arg0: i32) -> (i32, i32) {
    %c0_i32 = arith.constant 0 : i32
    %c0_i32_0 = arith.constant 0 : i32
    return %arg0, %c0_i32 : i32, i32
  }
  func.func @transform_2(%arg0: i32) -> (i32, i32) {
    %c0_i32 = arith.constant 0 : i32
    %c0_i32_0 = arith.constant 0 : i32
    %c0_i32_1 = arith.constant 0 : i32
    return %c0_i32, %c0_i32_0 : i32, i32
  }
  func.func @transform_3(%arg0: i32) -> i32 {
    %c0_i32 = arith.constant 0 : i32
    %c0_i32_0 = arith.constant 0 : i32
    return %c0_i32 : i32
  }
  func.func @transform_4(%arg0: i32) -> (i32, i32) {
    %c0_i32 = arith.constant 0 : i32
    %c0_i32_0 = arith.constant 0 : i32
    return %arg0, %c0_i32 : i32, i32
  }
  func.func @transform_5(%arg0: i32) -> (i32, i32) {
    %c0_i32 = arith.constant 0 : i32
    %c0_i32_0 = arith.constant 0 : i32
    return %arg0, %c0_i32 : i32, i32
  }
  func.func @transform_6(%arg0: i32) -> (i32, i32) {
    %c0_i32 = arith.constant 0 : i32
    %c0_i32_0 = arith.constant 0 : i32
    return %arg0, %c0_i32 : i32, i32
  }
}

</mosaic_0001>

<bundles_post_ra>
// kernel: attention_forward.1
= control target key start
LH: loop header
LB: loop body
LE: loop exit
PB: predicated region body
PF: predicated region fallthrough
CT: control target
= control target key end

     0   :  { %vm36_vm0 = vcmask 261120   ;;  %s259_s0 = inlined_call_operand.vmem [shape: f32[2,8,32], index: 0, kind: input, shape index: {}]   ;;  %s260_s1 = inlined_call_operand.vmem [shape: f32[2,8], index: 1, kind: input, shape index: {}]   ;;  %s261_s2 = inlined_call_operand.vmem [shape: f32[1,32], index: 2, kind: input, shape index: {}]   ;;  %s262_s3 = inlined_call_operand.<no memory space> [shape: f32[1], index: 3, kind: input, shape index: {}]   ;;  %s263_s4 = inlined_call_operand.vmem [shape: f32[2,32], index: 4, kind: output, shape index: {0}]   ;;  %s264_s5 = inlined_call_operand.hbm [shape: f32[2,8], index: 5, kind: output, shape index: {1}]   ;;  %s265_s6 = inlined_call_operand.vmem [shape: f32[2,1], index: 6, kind: output, shape index: {2}]  }
   0x1   :  { %v209_v0 = vld [vmem:[%s259_s0] sm:$0xff]  ;;  %v217_v2 = vld [vmem:[%s259_s0 + $0x8] sm:$0xff] }
   0x2   :  { %v140_v1 = vld [vmem:[%s261_s2] ss:$0 sm:$0xff] }
   0x3   :  { %v34_v3 = vmul.f32 %v140_v1, %v209_v0  ;;  %v35_v4 = vmul.f32 %v140_v1, %v217_v2 }
   0x4   :  { %13 = vsyncpa [#allocation4], 0  ;;  %v48_v7 = vlaneseq  ;;  %v43_v10 = vstv %s262_s3  ;;  %v24_v15 = vld [vmem:[%s260_s1] sm:$0x3]  ;;  %vm58_vm1 = vcmask 1041409   ;;  %vm62_vm3 = vcmask 58368  }
   0x5   :  { %v37_v5 = vsel %vm36_vm0, %v34_v3, 0.0  ;;  %v40_v6 = vsel %vm36_vm0, %v35_v4, 0.0  ;;  %vm25_vm2 = vcmp.gt.f32.partialorder %v24_v15, 0.0  ;;  %s170_s1 = smov [#allocation3]  }
   0x6   :  { %38 = vadd.xlane.f32.xlu0 %v37_v5  ;;  %v49_v8 = vand.u32 127, %v48_v7  ;;  %v51_v9 = vshrl.u32 %v48_v7, 7  ;;  %s126_s3 = sshll.u32 %s170_s1, 4  ;;  %s127_s3 = int_to_ptr.vmem [resolvable:$true] %s126_s3 }
   0x7   :  { %s146_s29 = scalar_lea.vmem %s127_s3, 32  ;;  %p151_p1 = scmp.lt.s32.totalorder %s127_s3, %s127_s3 }
   0x8   :  { %v52_v12 = vsub.s32 %v49_v8, %v51_v9  ;;  %v91_v29 = vsub.s32 1, %v51_v9  ;;  %v84_v30 = vsub.s32 0, %v51_v9  ;;  %p147_p0 = scmp.ne.s32.totalorder %s127_s3, %s146_s29  ;;  %p152_p2 = scmp.lt.s32.totalorder %s146_s29, %s146_s29 }
   0xa   :  { %41 = vadd.xlane.f32.xlu0 %v40_v6  ;;  %p153_p3 = por %p152_p2, %p151_p1 }
   0xc   :  { %p154_p4 = pnand %p153_p3, %p147_p0 }
  0x93   :  { %v39_v11 = vpop.xlane.xlu0 %38 }
  0x94   :  { %v44_v13 = vadd.f32 %v43_v10, %v39_v11 }
  0x96   :  { %v53_v17 = vrot.slane %v44_v13, %v52_v12 }
  0x97   :  { %v42_v14 = vpop.xlane.xlu0 %41 }
  0x98   :  { %v45_v16 = vadd.f32 %v43_v10, %v42_v14 }
  0x9a   :  { %v57_v18 = vrot.slane %v45_v16, %v52_v12 }
  0x9c   :  { %v59_v19 = vsel %vm58_vm1, %v57_v18, %v53_v17 }
  0x9d   :  { %v61_v20 = vsel %vm25_vm2, %v59_v19, -1e+32 }
  0x9e   :  { %v63_v21 = vsel %vm62_vm3, %v61_v20, -inf }
  0x9f   :  { %64 = vmax.xlane.f32.xlu1 %v63_v21 }
 0x12c   :  { %v65_v22 = vpop.xlane.xlu1 %64 }
 0x12d   :  { %v66_v23 = vsub.f32 %v61_v20, %v65_v22 }
 0x12f   :  { %v67_v24 = vmul.f32 1.442695, %v66_v23 }
 0x131   :  { %142 = vpow2.f32 %v67_v24 }
 0x13b   :  { %v143_v25 = vpop.eup %142 }
 0x13c   :  { %v69_v26 = vsel %vm62_vm3, %v143_v25, 0.0 }
 0x13d   :  { %70 = vadd.xlane.f32.xlu1 %v69_v26 }
 0x1ca   :  { %v71_v27 = vpop.xlane.xlu1 %70 }
 0x1cb   :  { %144 = vrcp.f32 %v71_v27 }
 0x1d5   :  { %v145_v28 = vpop.eup %144 }
 0x1d6   :  { %v74_v31 = vmul.f32 %v145_v28, %v143_v25 }
 0x1d8   :  { %v76_v32 = vsel %vm25_vm2, %v74_v31, 0.0  ;;  %75 = vst.msk [vmem:[#allocation3] sm:$0x3] %vm62_vm3, %v74_v31 }
 0x1d9   :  { %v92_v33 = vrot.slane %v76_v32, %v91_v29  ;;  %v85_v34 = vrot.slane %v76_v32, %v84_v30  ;;  %v77_v35 = vsel %vm62_vm3, %v76_v32, 0.0 }
 0x1db   :  { %94 = vbcast.lane.b32.xlu1 %v92_v33, 256  ;;  %87 = vbcast.lane.b32.xlu0 %v85_v34, 256 }
 0x1ff   :  { %78 = vadd.xlane.f32.xlu1 %v77_v35 }
 0x200   :  { %157 = shalt.err (!%p154_p4)
}
 0x201   :  { %s158_s8 = scalar_lea.hbm %s264_s5, 32 }
 0x202   :  { %p159_p5 = scmp.ne.s32.totalorder %s264_s5, %s158_s8  ;;  %p162_p6 = scmp.lt.u32.totalorder %s158_s8, %s264_s5 }
 0x204   :  { %p164_p7 = pnand %p162_p6, %p159_p5 }
 0x206   :  { %167 = shalt.err (!%p164_p7)
}
 0x207   :  { %129 = dma.vmem_to_hbm [thread:$0]  %s127_s3, 32, %s264_s5, [#allocation4]   ;;  %vm116_vm4 = vcmask 254976   ;;  %vm80_vm5 = vcmask 1024  }
 0x24d   :  { %v95_v36 = vpop.permute.xlu1 %94  ;;  %v88_v37 = vpop.permute.xlu0 %87 }
 0x24e   :  { %v97_v38 = vmul.f32 %v95_v36, %v217_v2  ;;  %v96_v39 = vmul.f32 %v88_v37, %v209_v0 }
 0x250   :  { %v105_v40 = vsel %vm36_vm0, %v97_v38, 0.0  ;;  %v98_v41 = vsel %vm36_vm0, %v96_v39, 0.0 }
 0x251   :  { %v106_v42 = vrot.slane %v105_v40, 4  ;;  %v99_v43 = vrot.slane %v98_v41, 4 }
 0x253   :  { %v107_v44 = vadd.f32 %v106_v42, %v105_v40  ;;  %v100_v45 = vadd.f32 %v99_v43, %v98_v41 }
 0x255   :  { %v108_v46 = vrot.slane %v107_v44, 2  ;;  %v101_v47 = vrot.slane %v100_v45, 2 }
 0x257   :  { %v109_v48 = vadd.f32 %v108_v46, %v107_v44  ;;  %v102_v49 = vadd.f32 %v101_v47, %v100_v45 }
 0x259   :  { %v110_v50 = vrot.slane %v109_v48, 1  ;;  %v103_v51 = vrot.slane %v102_v49, 1 }
 0x25b   :  { %v111_v52 = vadd.f32 %v110_v50, %v109_v48  ;;  %v104_v53 = vadd.f32 %v103_v51, %v102_v49 }
 0x25d   :  { %v114_v54 = vsel %vm58_vm1, %v111_v52, %v104_v53 }
 0x25e   :  { %117 = vst.msk [vmem:[%s263_s4] sm:$0x3] %vm116_vm4, %v114_v54 }
 0x28c   :  { %v79_v55 = vpop.xlane.xlu1 %78 }
 0x28d   :  { %81 = vst.msk [vmem:[%s265_s6] sm:$0x3] %vm80_vm5, %v79_v55 }
 0x28e   :  { %168 = dma.done.wait [#allocation4], 32  }
 0x28f   :  { %169 = vsyncadd [#allocation4], 4294967264 }
 0x290   :  { %139 = vsyncpa [#allocation4], 1 }

</bundles_post_ra>
